<compile_context>
chip_gen: v7x
topology: tpu7x:2x2x1
jax: 0.10.0
libtpu: 0.0.40
codegen_flags: <defaults>
</compile_context>

<pallas_src>
import math

import jax
import jax.numpy as jnp
from jax.experimental import pallas as pl
from jax.experimental.pallas import tpu as pltpu

NUM_MODES = 4


def _round_up(n, m):
    return ((n + m - 1) // m) * m


def _decision_kernel(h_ref, x_ref, c_ref, wh_ref, wx_ref, ws_ref, o_ref):
    # sharpness_squared_sum: sum(p**2) along last axis, keepdim -> (TB, 1)
    carr = c_ref[...]
    sharp = jnp.sum(carr * carr, axis=-1, keepdims=True)

    # logits = h @ Wh + x @ Wx + sharp @ Ws
    # ((B,1) @ (1,4) mm is a broadcasted product; avoid a degenerate MXU op.)
    logits = jnp.dot(h_ref[...], wh_ref[...],
                     preferred_element_type=jnp.float32)
    logits += jnp.dot(x_ref[...], wx_ref[...],
                      preferred_element_type=jnp.float32)
    logits += sharp * ws_ref[...]                                    # (TB, 4)

    # Numerically-stable softmax over the (tiny) last dim.  Exact divide: the
    # kernel is HBM-bound, so the EUP approx reciprocal saved nothing and cost
    # ~1e-3 of accuracy.
    m = jnp.max(logits, axis=-1, keepdims=True)
    e = jnp.exp(logits - m)
    denom = jnp.sum(e, axis=-1, keepdims=True)
    o_ref[...] = (e / denom).astype(o_ref.dtype)


def decision_forward(h_state, x, carr, Wh, Wx, Ws, *, block_b=4096):
    B, H = h_state.shape
    I = x.shape[1]
    C = carr.shape[1]

    # Batch tile.  Per-row VMEM (128-lane padded, f32, double-buffered):
    #   3 inputs + 1 output  ->  4 * 2 * 512 B = 4 KiB/row
    # so tb=4096 ~= 16 MiB.  Cap at ceil(B/2) (sublane-rounded) so the grid
    # has >= 2 steps whenever B > 8, letting the "parallel" batch axis use
    # both TensorCores on v7x.
    tb = min(block_b, max(8, _round_up(pl.cdiv(B, 2), 8)))
    grid = (pl.cdiv(B, tb),)   # partial last block handled by Pallas

    batch_spec = lambda cols: pl.BlockSpec((tb, cols), lambda i: (i, 0))
    weight_spec = lambda shape: pl.BlockSpec(shape, lambda i: (0, 0))

    cost = pl.CostEstimate(
        flops=2 * B * (H + I) * NUM_MODES + B * (2 * C + 3 * NUM_MODES),
        transcendentals=B * NUM_MODES,
        bytes_accessed=4 * (B * (H + I + C + NUM_MODES)
                            + (H + I + 1) * NUM_MODES),
    )

    theta = pl.pallas_call(
        _decision_kernel,
        out_shape=jax.ShapeDtypeStruct((B, NUM_MODES), jnp.float32),
        grid=grid,
        in_specs=[
            batch_spec(H),           # h_state tile
            batch_spec(I),           # x tile
            batch_spec(C),           # carr tile
            weight_spec(Wh.shape),   # VMEM-resident across steps
            weight_spec(Wx.shape),
            weight_spec(Ws.shape),
        ],
        out_specs=pl.BlockSpec((tb, NUM_MODES), lambda i: (i, 0)),
        compiler_params=pltpu.CompilerParams(
            dimension_semantics=("parallel",),
            # 32 MiB is safe on every generation (v7x default, < v5e/v6e
            # physical) and gives tb=4096 headroom on v5e's 16 MiB default.
            vmem_limit_bytes=32 * 1024 * 1024,
        ),
        cost_estimate=cost,
    )(h_state, x, carr, Wh, Wx, Ws)

    return theta


def xavier_uniform(key, shape, dtype=jnp.float32):
    fan_in, fan_out = shape[0], shape[1]
    bound = math.sqrt(6.0 / (fan_in + fan_out))
    return jax.random.uniform(key, shape, dtype, minval=-bound, maxval=bound)


def _reference(h_state, x, carr, Wh, Wx, Ws):
    sharp = jnp.sum(carr ** 2, axis=-1, keepdims=True)
    logits = (jnp.dot(h_state, Wh, precision=jax.lax.Precision.HIGHEST)
              + jnp.dot(x, Wx, precision=jax.lax.Precision.HIGHEST)
              + sharp * Ws)
    return jax.nn.softmax(logits, axis=-1)


if __name__ == "__main__":
    hidden_size = 32
    input_size = 16
    carr_size = 8

    key = jax.random.PRNGKey(0)
    k_wx, k_wh, k_ws = jax.random.split(key, 3)

    # Parameters (deterministic xavier_uniform init, same shapes as module).
    Wx = xavier_uniform(k_wx, (input_size, NUM_MODES))
    Wh = xavier_uniform(k_wh, (hidden_size, NUM_MODES))
    Ws = xavier_uniform(k_ws, (1, NUM_MODES))

    ok = True
    for batch in (8, 13):  # 13 exercises the partial-last-block path
        kb = jax.random.fold_in(key, batch)
        k_h, k_x, k_c = jax.random.split(kb, 3)
        h_state = jax.random.normal(k_h, (batch, hidden_size), jnp.float32)
        x = jax.random.normal(k_x, (batch, input_size), jnp.float32)
        carr = jax.random.normal(k_c, (batch, carr_size), jnp.float32)

        theta = decision_forward(h_state, x, carr, Wh, Wx, Ws)
        theta = jax.block_until_ready(theta)

        ref = _reference(h_state, x, carr, Wh, Wx, Ws)
        assert theta.shape == (batch, NUM_MODES)
        ok &= bool(jnp.allclose(theta, ref, atol=1e-5, rtol=1e-5))
        ok &= bool(jnp.allclose(jnp.sum(theta, axis=-1), 1.0, atol=1e-5))

    assert ok
    print("KERNEL_OK")
</pallas_src>

<mosaic_0001>
module attributes {stable_mosaic.version = 11 : i64} {
  func.func @_decision_kernel(%arg0: i32, %arg1: memref<8x32xf32, #tpu.memory_space<vmem>>, %arg2: memref<8x16xf32, #tpu.memory_space<vmem>>, %arg3: memref<8x8xf32, #tpu.memory_space<vmem>>, %arg4: memref<32x4xf32, #tpu.memory_space<vmem>>, %arg5: memref<16x4xf32, #tpu.memory_space<vmem>>, %arg6: memref<1x4xf32, #tpu.memory_space<vmem>>, %arg7: memref<8x4xf32, #tpu.memory_space<vmem>>) attributes {dimension_semantics = [#tpu.dimension_semantics<parallel>], iteration_bounds = array<i64: 1>, scalar_prefetch = 0 : i64, scratch_operands = 0 : i64, tpu.core_type = #tpu.core_type<tc>, window_params = [{transform_indices = @transform_0, window_bounds = array<i64: 8, 32>}, {transform_indices = @transform_1, window_bounds = array<i64: 8, 16>}, {transform_indices = @transform_2, window_bounds = array<i64: 8, 8>}, {pipeline_mode = #tpu.pipeline_mode<synchronous>, transform_indices = @transform_3, window_bounds = array<i64: 32, 4>}, {pipeline_mode = #tpu.pipeline_mode<synchronous>, transform_indices = @transform_4, window_bounds = array<i64: 16, 4>}, {pipeline_mode = #tpu.pipeline_mode<synchronous>, transform_indices = @transform_5, window_bounds = array<i64: 1, 4>}, {transform_indices = @transform_6, window_bounds = array<i64: 8, 4>}]} {
    %c0 = arith.constant 0 : index
    %c0_0 = arith.constant 0 : index
    %0 = vector.load %arg3[%c0, %c0_0] : memref<8x8xf32, #tpu.memory_space<vmem>>, vector<8x8xf32>
    %1 = arith.mulf %0, %0 : vector<8x8xf32>
    %cst = arith.constant dense<0.000000e+00> : vector<8xf32>
    %2 = vector.multi_reduction <add>, %1, %cst [1] : vector<8x8xf32> to vector<8xf32>
    %3 = vector.shape_cast %2 : vector<8xf32> to vector<8x1xf32>
    %c0_1 = arith.constant 0 : index
    %c0_2 = arith.constant 0 : index
    %4 = vector.load %arg1[%c0_1, %c0_2] : memref<8x32xf32, #tpu.memory_space<vmem>>, vector<8x32xf32>
    %c0_3 = arith.constant 0 : index
    %c0_4 = arith.constant 0 : index
    %5 = vector.load %arg4[%c0_3, %c0_4] : memref<32x4xf32, #tpu.memory_space<vmem>>, vector<32x4xf32>
    %cst_5 = arith.constant dense<0.000000e+00> : vector<8x4xf32>
    %6 = tpu.matmul %4, %5, %cst_5 {dimension_numbers = #tpu.dot_dimension_numbers<[1], [0], [0], [1], [0, 0, 1, 1], [], []>} : vector<8x32xf32>, vector<32x4xf32>, vector<8x4xf32> -> vector<8x4xf32>
    %c0_6 = arith.constant 0 : index
    %c0_7 = arith.constant 0 : index
    %7 = vector.load %arg2[%c0_6, %c0_7] : memref<8x16xf32, #tpu.memory_space<vmem>>, vector<8x16xf32>
    %c0_8 = arith.constant 0 : index
    %c0_9 = arith.constant 0 : index
    %8 = vector.load %arg5[%c0_8, %c0_9] : memref<16x4xf32, #tpu.memory_space<vmem>>, vector<16x4xf32>
    %cst_10 = arith.constant dense<0.000000e+00> : vector<8x4xf32>
    %9 = tpu.matmul %7, %8, %cst_10 {dimension_numbers = #tpu.dot_dimension_numbers<[1], [0], [0], [1], [0, 0, 1, 1], [], []>} : vector<8x16xf32>, vector<16x4xf32>, vector<8x4xf32> -> vector<8x4xf32>
    %10 = arith.addf %6, %9 : vector<8x4xf32>
    %c0_11 = arith.constant 0 : index
    %c0_12 = arith.constant 0 : index
    %11 = vector.load %arg6[%c0_11, %c0_12] : memref<1x4xf32, #tpu.memory_space<vmem>>, vector<1x4xf32>
    %12 = vector.broadcast %3 : vector<8x1xf32> to vector<8x4xf32>
    %13 = vector.broadcast %11 : vector<1x4xf32> to vector<8x4xf32>
    %14 = arith.mulf %12, %13 : vector<8x4xf32>
    %15 = arith.addf %10, %14 : vector<8x4xf32>
    %cst_13 = arith.constant dense<0xFF800000> : vector<8xf32>
    %16 = vector.multi_reduction <maximumf>, %15, %cst_13 [1] : vector<8x4xf32> to vector<8xf32>
    %17 = vector.shape_cast %16 : vector<8xf32> to vector<8x1xf32>
    %18 = vector.broadcast %17 : vector<8x1xf32> to vector<8x4xf32>
    %19 = arith.subf %15, %18 : vector<8x4xf32>
    %20 = math.exp %19 : vector<8x4xf32>
    %cst_14 = arith.constant dense<0.000000e+00> : vector<8xf32>
    %21 = vector.multi_reduction <add>, %20, %cst_14 [1] : vector<8x4xf32> to vector<8xf32>
    %22 = vector.shape_cast %21 : vector<8xf32> to vector<8x1xf32>
    %23 = vector.broadcast %22 : vector<8x1xf32> to vector<8x4xf32>
    %24 = arith.divf %20, %23 : vector<8x4xf32>
    %c0_15 = arith.constant 0 : index
    %c0_16 = arith.constant 0 : index
    %25 = vector.load %arg7[%c0_15, %c0_16] : memref<8x4xf32, #tpu.memory_space<vmem>>, vector<8x4xf32>
    tpu.vector_store %arg7[%c0_15, %c0_16], %24 {strides = array<i32>} : memref<8x4xf32, #tpu.memory_space<vmem>>, vector<8x4xf32>,
    return
  }
  func.func @transform_0(%arg0: i32) -> (i32, i32) {
    %c0_i32 = arith.constant 0 : i32
    %c0_i32_0 = arith.constant 0 : i32
    return %arg0, %c0_i32 : i32, i32
  }
  func.func @transform_1(%arg0: i32) -> (i32, i32) {
    %c0_i32 = arith.constant 0 : i32
    %c0_i32_0 = arith.constant 0 : i32
    return %arg0, %c0_i32 : i32, i32
  }
  func.func @transform_2(%arg0: i32) -> (i32, i32) {
    %c0_i32 = arith.constant 0 : i32
    %c0_i32_0 = arith.constant 0 : i32
    return %arg0, %c0_i32 : i32, i32
  }
  func.func @transform_3(%arg0: i32) -> (i32, i32) {
    %c0_i32 = arith.constant 0 : i32
    %c0_i32_0 = arith.constant 0 : i32
    %c0_i32_1 = arith.constant 0 : i32
    return %c0_i32, %c0_i32_0 : i32, i32
  }
  func.func @transform_4(%arg0: i32) -> (i32, i32) {
    %c0_i32 = arith.constant 0 : i32
    %c0_i32_0 = arith.constant 0 : i32
    %c0_i32_1 = arith.constant 0 : i32
    return %c0_i32, %c0_i32_0 : i32, i32
  }
  func.func @transform_5(%arg0: i32) -> (i32, i32) {
    %c0_i32 = arith.constant 0 : i32
    %c0_i32_0 = arith.constant 0 : i32
    %c0_i32_1 = arith.constant 0 : i32
    return %c0_i32, %c0_i32_0 : i32, i32
  }
  func.func @transform_6(%arg0: i32) -> (i32, i32) {
    %c0_i32 = arith.constant 0 : i32
    %c0_i32_0 = arith.constant 0 : i32
    return %arg0, %c0_i32 : i32, i32
  }
}

</mosaic_0001>

<bundles_post_ra>
// kernel: tpu_custom_call.1
= control target key start
LH: loop header
LB: loop body
LE: loop exit
PB: predicated region body
PF: predicated region fallthrough
CT: control target
= control target key end

     0   :  { %v256_v0 = vmov 0.0|0.0   ;;  %vm257_vm0 = vmmov 0   ;;  %v258_v8 = vmov 0.0   ;;  %vm25_vm1 = vcmask 64512   ;;  %s330_s3 = inlined_call_operand.vmem [shape: f32[32,4], index: 3, kind: input, shape index: {}]   ;;  %s331_s4 = inlined_call_operand.vmem [shape: f32[16,4], index: 4, kind: input, shape index: {}]   ;;  %s332_s2 = inlined_call_operand.vmem [shape: f32[8,8], index: 2, kind: input, shape index: {}]   ;;  %s333_s1 = inlined_call_operand.vmem [shape: f32[8,16], index: 1, kind: input, shape index: {}]   ;;  %s334_s0 = inlined_call_operand.vmem [shape: f32[8,32], index: 0, kind: input, shape index: {}]   ;;  %s335_s5 = inlined_call_operand.vmem [shape: f32[1,4], index: 5, kind: input, shape index: {}]   ;;  %s336_s6 = inlined_call_operand.vmem [shape: f32[8,4], index: 6, kind: output, shape index: {}]  }
   0x1   :  { %243 = vmatprep.subr.bf16.mxu1 %v256_v0  ;;  %v30_v1 = vld [vmem:[%s330_s3] sm:$0xff]  ;;  %v31_v2 = vld [vmem:[%s330_s3 + $0x8] sm:$0xff]  ;;  %240 = vmatprep.subr.bf16.mxu0 %v256_v0  ;;  %v32_v6 = vld [vmem:[%s330_s3 + $0x10] sm:$0xff]  ;;  %vm37_vm2 = vcmask 130048   ;;  %vm111_vm3 = vcmask 261120   ;;  %vm194_vm4 = vcmask 31744  }
   0x2   :  { %v35_v3 = vld [vmem:[%s331_s4] sm:$0xff]  ;;  %v244_v4 = vpack.c.bf16 %v31_v2, %v30_v1  ;;  %v36_v5 = vld [vmem:[%s331_s4 + $0x8] sm:$0xff]  ;;  %v33_v7 = vld [vmem:[%s330_s3 + $0x18] sm:$0xff]  ;;  %226 = vmatprep.mubr.msk.f32.mxu0 %vm257_vm0, %v258_v8  ;;  %237 = vmatprep.mubr.msk.f32.mxu1 %vm257_vm0, %v258_v8 }
   0x3   :  { %v241_v9 = vpack.c.bf16 %v36_v5, %v35_v3  ;;  %v23_v10 = vld [vmem:[%s332_s2] sm:$0xff]  ;;  %v247_v11 = vpack.c.bf16 %v33_v7, %v32_v6 }
   0x4   :  { %245 = vmatpush3.bf16.msra.mxu1 %v244_v4  ;;  %v24_v12 = vmul.f32 %v23_v10, %v23_v10  ;;  %v34_v13 = vld [vmem:[%s333_s1] sm:$0xff] }
   0x5   :  { %242 = vmatpush3.bf16.msra.mxu0 %v241_v9  ;;  %246 = vmatprep.subr.bf16.mxu1 %v256_v0  ;;  %v29_v15 = vld [vmem:[%s334_s0] sm:$0xff] }
   0x6   :  { %v26_v14 = vsel %vm25_vm1, %v24_v12, 0.0  ;;  %v213_v16 = vld [vmem:[%s335_s5] ss:$0 sm:$0xff] }
   0x7   :  { %27 = vadd.xlane.f32.xlu0 %v26_v14 }
   0x8   :  { %248 = vmatpush3.bf16.msra.mxu1 %v247_v11  ;;  %227 = vmatmul.mubr.msk.f32.vlgmr.msra.gmra.mrb[0].mxu0 %vm37_vm2, %v34_v13 }
   0xb   :  { %238 = vmatmul.mubr.msk.f32.vlgmr.msra.gmra.mrb[0].mxu1 %vm111_vm3, %v29_v15 }
  0x94   :  { %v28_v17 = vpop.xlane.xlu0 %27 }
  0x95   :  { %v192_v20 = vmul.f32 %v213_v16, %v28_v17 }
  0xdb   :  { %v107_v18 = vpop.f32.mrb[0].mxu0 }
  0xdc   :  { %v228_v19 = vpop.f32.mrb[1].mxu0 }
  0xde   :  { %v181_v21 = vpop.f32.mrb[0].mxu1 }
  0xdf   :  { %v182_v22 = vadd.f32 %v181_v21, %v107_v18  ;;  %v239_v23 = vpop.f32.mrb[1].mxu1 }
  0xe1   :  { %v193_v24 = vadd.f32 %v192_v20, %v182_v22 }
  0xe3   :  { %v195_v25 = vsel %vm194_vm4, %v193_v24, -inf }
  0xe4   :  { %196 = vmax.xlane.f32.xlu0 %v195_v25 }
 0x171   :  { %v197_v26 = vpop.xlane.xlu0 %196 }
 0x172   :  { %v198_v27 = vsub.f32 %v193_v24, %v197_v26 }
 0x174   :  { %v199_v28 = vmul.f32 1.442695, %v198_v27 }
 0x176   :  { %252 = vpow2.f32 %v199_v28 }
 0x180   :  { %v253_v29 = vpop.eup %252 }
 0x181   :  { %v201_v30 = vsel %vm194_vm4, %v253_v29, 0.0 }
 0x182   :  { %202 = vadd.xlane.f32.xlu1 %v201_v30 }
 0x20f   :  { %v203_v31 = vpop.xlane.xlu1 %202 }
 0x210   :  { %254 = vrcp.f32 %v203_v31 }
 0x21a   :  { %v255_v32 = vpop.eup %254 }
 0x21b   :  { %v205_v33 = vmul.f32 %v255_v32, %v253_v29 }
 0x21d   :  { %206 = vst.msk [vmem:[%s336_s6] sm:$0xff] %vm194_vm4, %v205_v33 }

</bundles_post_ra>
